<compile_context>
chip_gen: v6e
topology: v6e:2x2x1
jax: 0.10.0
libtpu: 0.0.40
codegen_flags: <defaults>
</compile_context>

<pallas_src>
import jax
import jax.numpy as jnp
from jax import lax
from jax.experimental import pallas as pl
from jax.experimental.pallas import tpu as pltpu


def _pick_s_tile(S, target=512):
    """Largest divisor of S that is <= target and a multiple of 8 (else S itself)."""
    if S <= target:
        return S
    for ts in range(target, 7, -1):
        if S % ts == 0 and ts % 8 == 0:
            return ts
    return S


# --------------------------------------------------------------------------------------
# Kernel 1: per-sample column sums  (sum_s x, sum_s x*x)  accumulated across S tiles.
# --------------------------------------------------------------------------------------
def _stats_kernel(x_ref, m_ref):
    # x_ref : (ts, C)   channels-last input tile of one sample
    # m_ref : (2, C)    resident accumulator: row0 = sum_s x, row1 = sum_s x*x
    s = pl.program_id(1)

    @pl.when(s == 0)
    def _():
        m_ref[...] = jnp.zeros_like(m_ref)

    x = x_ref[...].astype(jnp.float32)
    m_ref[0:1, :] = m_ref[0:1, :] + jnp.sum(x, axis=0, keepdims=True)
    m_ref[1:2, :] = m_ref[1:2, :] + jnp.sum(x * x, axis=0, keepdims=True)


# --------------------------------------------------------------------------------------
# Kernel 2: fused (upsample ∘ GroupNorm-affine ∘ 1x1x1 conv) as one lane-dense matmul.
# --------------------------------------------------------------------------------------
def _main_kernel(x_ref, m_ref, scale_ref, const_ref, o_ref):
    # x_ref     : (ts, C)        channels-last input tile
    # m_ref     : (C, r3*C)      folded weight  M[c, t*C+o] = Wt[c,t]*gamma[c]*Wpw[c,o]
    # scale_ref : (1, C)         per-sample inv_std broadcast row
    # const_ref : (1, r3*C)      per-sample constant row (bias/mean/beta folded thru Wpw)
    # o_ref     : (ts, r3*C)     lane-dense output tile
    xs = x_ref[...] * scale_ref[...]
    y = jnp.dot(xs, m_ref[...], preferred_element_type=jnp.float32)
    o_ref[...] = (y + const_ref[...]).astype(o_ref.dtype)


def local_reverse_diffusion(x, conv_t_w, conv_t_b, gn_w, gn_b, pw_w, r):
    """x: (N, C, D, H, W).  Returns (N, C, D*r, H*r, W*r), matching the PyTorch module."""
    N, C, D, H, W = x.shape
    S = D * H * W
    r3 = r ** 3
    ts = _pick_s_tile(S)
    n_s = S // ts
    eps = 1e-5

    f32 = jnp.float32

    # ---- glue: NCDHW -> channels-last flattened (N, S, C) ----
    x_cl = jnp.transpose(x, (0, 2, 3, 4, 1)).reshape(N, S, C).astype(f32)

    wt_ct = conv_t_w.reshape(C, r3).astype(f32)        # [c, t], t = i*r*r + j*r + k
    bias = conv_t_b.astype(f32)                        # (C,)
    gamma = gn_w.astype(f32)                           # (C,)
    beta = gn_b.astype(f32)                            # (C,)
    wpw = pw_w.reshape(C, C).T.astype(f32)             # [c_in, c_out]

    # ---- Pallas call 1: per-sample column sums over S ----
    moments = pl.pallas_call(
        _stats_kernel,
        out_shape=jax.ShapeDtypeStruct((N, 2, C), f32),
        grid_spec=pltpu.PrefetchScalarGridSpec(
            num_scalar_prefetch=0,
            grid=(N, n_s),
            in_specs=[pl.BlockSpec((None, ts, C), lambda n, s: (n, s, 0))],
            out_specs=pl.BlockSpec((None, 2, C), lambda n, s: (n, 0, 0)),
        ),
        compiler_params=pltpu.CompilerParams(
            dimension_semantics=("parallel", "arbitrary")),
    )(x_cl)

    colx = moments[:, 0, :]                            # (N, C)  sum_s x
    colxx = moments[:, 1, :]                           # (N, C)  sum_s x*x

    # ---- closed-form GroupNorm(num_groups=1) statistics (tiny (N, C) XLA math) ----
    a_vec = jnp.sum(wt_ct, axis=1)                     # A[c] = sum_t Wt[c,t]
    b_vec = jnp.sum(wt_ct * wt_ct, axis=1)             # B[c] = sum_t Wt[c,t]^2
    total = float(S * r3 * C)

    s1 = colx @ a_vec + float(S * r3) * jnp.sum(bias)                       # (N,)
    mean = s1 / total                                                       # (N,)
    d = bias[None, :] - mean[:, None]                                       # (N, C)
    s2 = (colxx @ b_vec
          + 2.0 * jnp.sum(colx * a_vec[None, :] * d, axis=1)
          + float(S * r3) * jnp.sum(d * d, axis=1))                         # centered
    var = s2 / total
    inv_std = lax.rsqrt(var + eps)                                          # (N,)

    # ---- fold weights; build per-sample rows ----
    m_big = (wt_ct[:, :, None] * gamma[:, None, None]
             * wpw[:, None, :]).reshape(C, r3 * C)                          # (C, r3*C)

    p1 = (bias * gamma) @ wpw                                               # (C,)
    p2 = gamma @ wpw                                                        # (C,)
    p3 = beta @ wpw                                                         # (C,)
    const_c = (inv_std[:, None] * (p1[None, :] - mean[:, None] * p2[None, :])
               + p3[None, :])                                               # (N, C)
    const_rows = jnp.tile(const_c, (1, r3)).reshape(N, 1, r3 * C)
    scale_rows = (inv_std[:, None, None]
                  * jnp.ones((1, 1, C), f32)).astype(f32)                   # (N, 1, C)

    # ---- Pallas call 2: fused matmul, lane-dense (N, S, r3*C) output ----
    # Blocks are small by construction (ts <= 512), so the default scoped-VMEM limit
    # is ample even on v7x (64 MiB physical / 32 MiB default scoped).
    out_cl = pl.pallas_call(
        _main_kernel,
        out_shape=jax.ShapeDtypeStruct((N, S, r3 * C), f32),
        grid_spec=pltpu.PrefetchScalarGridSpec(
            num_scalar_prefetch=0,
            grid=(N, n_s),
            in_specs=[
                pl.BlockSpec((None, ts, C), lambda n, s: (n, s, 0)),        # x tile
                pl.BlockSpec((C, r3 * C), lambda n, s: (0, 0)),             # folded W
                pl.BlockSpec((None, 1, C), lambda n, s: (n, 0, 0)),         # inv_std row
                pl.BlockSpec((None, 1, r3 * C), lambda n, s: (n, 0, 0)),    # const row
            ],
            out_specs=pl.BlockSpec((None, ts, r3 * C), lambda n, s: (n, s, 0)),
        ),
        compiler_params=pltpu.CompilerParams(
            dimension_semantics=("parallel", "parallel")),
    )(x_cl, m_big, scale_rows, const_rows)

    # ---- glue: (N, S, r3*C) -> (N, C, D*r, H*r, W*r) ----
    out = out_cl.reshape(N, D, H, W, r, r, r, C)        # (n, d, h, w, i, j, k, c)
    out = jnp.transpose(out, (0, 7, 1, 4, 2, 5, 3, 6))  # (n, c, d, i, h, j, w, k)
    out = out.reshape(N, C, D * r, H * r, W * r)
    return out.astype(x.dtype)


def reference(x, conv_t_w, conv_t_b, gn_w, gn_b, pw_w, r):
    """Plain-JAX reference reproducing the PyTorch forward semantics."""
    N, C, D, H, W = x.shape
    w = conv_t_w[:, 0]                                   # (C, r, r, r)
    y = (x[:, :, :, None, :, None, :, None]
         * w[None, :, None, :, None, :, None, :])
    y = y + conv_t_b[None, :, None, None, None, None, None, None]
    y = y.reshape(N, C, D * r, H * r, W * r)
    mean = y.mean(axis=(1, 2, 3, 4), keepdims=True)
    var = ((y - mean) ** 2).mean(axis=(1, 2, 3, 4), keepdims=True)
    yn = (y - mean) / jnp.sqrt(var + 1e-5)
    yn = yn * gn_w[None, :, None, None, None] + gn_b[None, :, None, None, None]
    return jnp.einsum('oc,ncdhw->nodhw', pw_w[:, :, 0, 0, 0], yn)


if __name__ == "__main__":
    # C=16, r=2 -> r^3*C = 128 lane-dense output; S = 512 -> single 512-row tile.
    N, C, D, H, W, r = 2, 16, 8, 8, 8, 2

    key = jax.random.PRNGKey(0)
    ks = jax.random.split(key, 6)
    x = jax.random.normal(ks[0], (N, C, D, H, W), jnp.float32)
    conv_t_w = 0.2 * jax.random.normal(ks[1], (C, 1, r, r, r), jnp.float32)
    conv_t_b = 0.1 * jax.random.normal(ks[2], (C,), jnp.float32)
    gn_w = 1.0 + 0.1 * jax.random.normal(ks[3], (C,), jnp.float32)
    gn_b = 0.1 * jax.random.normal(ks[4], (C,), jnp.float32)
    pw_w = 0.2 * jax.random.normal(ks[5], (C, C, 1, 1, 1), jnp.float32)

    out = local_reverse_diffusion(x, conv_t_w, conv_t_b, gn_w, gn_b, pw_w, r)
    out = jax.block_until_ready(out)

    assert out.shape == (N, C, D * r, H * r, W * r)
    ref = reference(x, conv_t_w, conv_t_b, gn_w, gn_b, pw_w, r)
    max_err = float(jnp.max(jnp.abs(out - ref)))
    assert max_err < 1e-3, f"mismatch vs reference, max abs err = {max_err}"

    print("KERNEL_OK")
</pallas_src>

<mosaic_0001>
module attributes {stable_mosaic.version = 11 : i64} {
  func.func @_stats_kernel(%arg0: i32, %arg1: i32, %arg2: memref<1x512x16xf32, #tpu.memory_space<vmem>>, %arg3: memref<1x2x16xf32, #tpu.memory_space<vmem>>) attributes {dimension_semantics = [#tpu.dimension_semantics<parallel>, #tpu.dimension_semantics<arbitrary>], iteration_bounds = array<i64: 2, 1>, scalar_prefetch = 0 : i64, scratch_operands = 0 : i64, tpu.core_type = #tpu.core_type<tc>, window_params = [{transform_indices = @transform_0, window_bounds = array<i64: 1, 512, 16>}, {transform_indices = @transform_1, window_bounds = array<i64: 1, 2, 16>}]} {
    %c0_i32 = arith.constant 0 : i32
    %0 = arith.cmpi eq, %arg1, %c0_i32 : i32
    %1 = arith.extui %0 : i1 to i32
    %c0_i32_0 = arith.constant 0 : i32
    %2 = arith.cmpi ne, %1, %c0_i32_0 : i32
    scf.if %2 {
      %cst_15 = arith.constant 0.000000e+00 : f32
      %22 = vector.broadcast %cst_15 : f32 to vector<2x16xf32>
      %c0_16 = arith.constant 0 : index
      %c0_17 = arith.constant 0 : index
      %c0_18 = arith.constant 0 : index
      %23 = vector.load %arg3[%c0_16, %c0_17, %c0_18] : memref<1x2x16xf32, #tpu.memory_space<vmem>>, vector<1x2x16xf32>
      %24 = vector.shape_cast %23 : vector<1x2x16xf32> to vector<2x16xf32>
      %25 = vector.shape_cast %22 : vector<2x16xf32> to vector<1x2x16xf32>
      tpu.vector_store %arg3[%c0_16, %c0_17, %c0_18], %25 {strides = array<i32>} : memref<1x2x16xf32, #tpu.memory_space<vmem>>, vector<1x2x16xf32>,
    } else {
    }
    %c0 = arith.constant 0 : index
    %c0_1 = arith.constant 0 : index
    %c0_2 = arith.constant 0 : index
    %3 = vector.load %arg2[%c0, %c0_1, %c0_2] : memref<1x512x16xf32, #tpu.memory_space<vmem>>, vector<1x512x16xf32>
    %4 = vector.shape_cast %3 : vector<1x512x16xf32> to vector<512x16xf32>
    %c0_3 = arith.constant 0 : index
    %c0_4 = arith.constant 0 : index
    %c0_5 = arith.constant 0 : index
    %5 = vector.load %arg3[%c0_3, %c0_4, %c0_5] : memref<1x2x16xf32, #tpu.memory_space<vmem>>, vector<1x1x16xf32>
    %6 = vector.shape_cast %5 : vector<1x1x16xf32> to vector<1x16xf32>
    %cst = arith.constant dense<0.000000e+00> : vector<16xf32>
    %7 = vector.multi_reduction <add>, %4, %cst [0] : vector<512x16xf32> to vector<16xf32>
    %8 = vector.shape_cast %7 : vector<16xf32> to vector<1x16xf32>
    %9 = arith.addf %6, %8 : vector<1x16xf32>
    %c0_6 = arith.constant 0 : index
    %c0_7 = arith.constant 0 : index
    %c0_8 = arith.constant 0 : index
    %10 = vector.load %arg3[%c0_6, %c0_7, %c0_8] : memref<1x2x16xf32, #tpu.memory_space<vmem>>, vector<1x1x16xf32>
    %11 = vector.shape_cast %10 : vector<1x1x16xf32> to vector<1x16xf32>
    %12 = vector.shape_cast %9 : vector<1x16xf32> to vector<1x1x16xf32>
    tpu.vector_store %arg3[%c0_6, %c0_7, %c0_8], %12 {strides = array<i32>} : memref<1x2x16xf32, #tpu.memory_space<vmem>>, vector<1x1x16xf32>,
    %c0_9 = arith.constant 0 : index
    %c1 = arith.constant 1 : index
    %c0_10 = arith.constant 0 : index
    %13 = vector.load %arg3[%c0_9, %c1, %c0_10] : memref<1x2x16xf32, #tpu.memory_space<vmem>>, vector<1x1x16xf32>
    %14 = vector.shape_cast %13 : vector<1x1x16xf32> to vector<1x16xf32>
    %15 = arith.mulf %4, %4 : vector<512x16xf32>
    %cst_11 = arith.constant dense<0.000000e+00> : vector<16xf32>
    %16 = vector.multi_reduction <add>, %15, %cst_11 [0] : vector<512x16xf32> to vector<16xf32>
    %17 = vector.shape_cast %16 : vector<16xf32> to vector<1x16xf32>
    %18 = arith.addf %14, %17 : vector<1x16xf32>
    %c0_12 = arith.constant 0 : index
    %c1_13 = arith.constant 1 : index
    %c0_14 = arith.constant 0 : index
    %19 = vector.load %arg3[%c0_12, %c1_13, %c0_14] : memref<1x2x16xf32, #tpu.memory_space<vmem>>, vector<1x1x16xf32>
    %20 = vector.shape_cast %19 : vector<1x1x16xf32> to vector<1x16xf32>
    %21 = vector.shape_cast %18 : vector<1x16xf32> to vector<1x1x16xf32>
    tpu.vector_store %arg3[%c0_12, %c1_13, %c0_14], %21 {strides = array<i32>} : memref<1x2x16xf32, #tpu.memory_space<vmem>>, vector<1x1x16xf32>,
    return
  }
  func.func @transform_0(%arg0: i32, %arg1: i32) -> (i32, i32, i32) {
    %c0_i32 = arith.constant 0 : i32
    %c0_i32_0 = arith.constant 0 : i32
    return %arg0, %arg1, %c0_i32 : i32, i32, i32
  }
  func.func @transform_1(%arg0: i32, %arg1: i32) -> (i32, i32, i32) {
    %c0_i32 = arith.constant 0 : i32
    %c0_i32_0 = arith.constant 0 : i32
    %c0_i32_1 = arith.constant 0 : i32
    return %arg0, %c0_i32, %c0_i32_0 : i32, i32, i32
  }
}

</mosaic_0001>

<bundles_post_ra>
// kernel: tpu_custom_call.1
= control target key start
LH: loop header
LB: loop body
LE: loop exit
PB: predicated region body
PF: predicated region fallthrough
CT: control target
= control target key end

     0   :  { %6 = vsyncpa [#allocation3], 0  ;;  %s1636_s0 = inlined_call_operand.vmem [shape: f32[2,512,16], index: 0, kind: input, shape index: {}]   ;;  %s1637_s1 = inlined_call_operand.hbm [shape: f32[2,2,16], index: 1, kind: output, shape index: {}]  }
   0x1   :  { %8 = vsyncpa [#allocation3 + $0x1], 0  ;;  %s797_s6 = smov 0   ;;  %s799_s7 = smov 0  }
   0x2   :  { %s801_s8 = smov 0   ;;  %s803_s9 = smov 0  }
   0x3   :  { %s805_s10 = smov 0   ;;  %s807_s11 = smov 0  }
   0x4 LB: > { %s638_s12 = sadd.s32 4294967295, %s783_s11   ;;  %s639_s13 = sadd.s32 4294967294, %s783_s11   ;;  %s783_s11 = sphi %s807_s11, %s14_s11   ;;  %s779_s10 = sphi %s805_s10, %s1770_s10   ;;  %s775_s9 = sphi %s803_s9, %s1769_s9   ;;  %s771_s8 = sphi %s801_s8, %s1768_s8   ;;  %s767_s7 = sphi %s799_s7, %s1767_s7   ;;  %s763_s6 = sphi %s797_s6, %s1766_s6  }
   0x5   : > { %s26_s14 = sadd.s32 1, %s779_s10  ;;  %s61_s15 = sadd.s32 1, %s771_s8 }
   0x6   : > { %p28_p0 = scmp.ge.s32.totalorder %s26_s14, 2  ;;  %p71_p1 = scmp.ne.s32.totalorder %s771_s8, %s767_s7 }
   0x7   : > { %p72_p2 = scmp.eq.s32.totalorder %s638_s12, 1  ;;  %p77_p3 = scmp.ne.s32.totalorder %s767_s7, %s763_s6 }
   0x8   : > { %s1772_s14 = smov (%p28_p0, %s26_s14), 0  ;;  %p78_p5 = scmp.eq.s32.totalorder %s639_s13, 1 }
   0x9   : > { %p837_p4 = por %p72_p2, %p71_p1  ;;  %s58_s17 = ssub.s32 %s779_s10, %s1772_s14 }
   0xa   : > { %p642_p6 = scmp.ge.s32.totalorder %s783_s11, 1  ;;  %p59_p7 = scmp.eq.s32.totalorder %s58_s17, 0 }
   0xb   : > { %p844_p8 = por %p78_p5, %p77_p3  ;;  %p109_p9 = scmp.lt.s32.totalorder %s783_s11, 3 }
   0xc   : > { %s850_s19 = scalar_select %p59_p7, %s771_s8, %s61_s15  }
   0xd   : > { %p110_p10 = pnand %p642_p6, %p109_p9 }
   0xf   : > { %113 = sbr.rel (%p110_p10) target bundleno = 218 (0xda), region = 24 }
  0x14   : > { %s130_s20 = sand.u32 1, %s767_s7   ;;  %p134_p11 = scmp.lt.s32.totalorder %s775_s9, 1  ;;  %vm147_vm0 = vcmask 123904   ;;  %v785_v0 = vmov 0.0   ;;  %vm214_vm1 = vcmask 130048   ;;  %vm349_vm2 = vcmask 122880  }
  0x15   : > { %s643_s21 = sshll.u32 %s130_s20, 1  ;;  %s647_s28 = sshll.u32 %s775_s9, 5 }
  0x16   : > { %s135_s22 = scalar_select %p134_p11, %s775_s9, 1 }
  0x17   : > { %s857_s23 = scalar_lea.vmem [#allocation2], %s643_s21  ;;  %s563_s3 = scalar_lea.hbm %s1637_s1, %s647_s28 }
  0x18   : > { %148 = vst.msk [vmem:[%s857_s23] sm:$0x3] %vm147_vm0, %v785_v0  ;;  %s650_s24 = sshll.u32 %s135_s22, 9  ;;  %s565_s29 = sshll.u32 %s857_s23, 4  ;;  %s566_s29 = int_to_ptr.vmem [resolvable:$true] %s565_s29 }
  0x19   : > { %s863_s27 = scalar_lea.vmem %s1636_s0, %s650_s24  ;;  %s552_s4 = scalar_lea.sflag [#allocation3], %s130_s20 }
  0x1a   : > { %v866_v1 = vld [vmem:[%s863_s27] sm:$0xff]  ;;  %v869_v2 = vld [vmem:[%s863_s27 + $0x8] sm:$0xff]  ;;  %v872_v3 = vld [vmem:[%s863_s27 + $0x10] sm:$0xff]  ;;  %s707_s5 = scalar_lea.vmem %s566_s29, 32  ;;  %s786_s12 = smov [#allocation2]  }
  0x1b   : > { %v215_v4 = vsel %vm214_vm1, %v866_v1, 0.0  ;;  %v216_v5 = vsel %vm214_vm1, %v869_v2, 0.0  ;;  %v218_v6 = vsel %vm214_vm1, %v872_v3, 0.0  ;;  %v881_v7 = vld [vmem:[%s863_s27 + $0x18] sm:$0xff]  ;;  %v886_v10 = vld [vmem:[%s863_s27 + $0x20] sm:$0xff]  ;;  %v891_v13 = vld [vmem:[%s863_s27 + $0x28] sm:$0xff]  ;;  %p708_p12 = scmp.ne.s32.totalorder %s566_s29, %s707_s5 }
  0x1c   : > { %v217_v8 = vadd.f32 %v216_v5, %v215_v4  ;;  %v220_v9 = vsel %vm214_vm1, %v881_v7, 0.0  ;;  %v222_v12 = vsel %vm214_vm1, %v886_v10, 0.0  ;;  %v224_v15 = vsel %vm214_vm1, %v891_v13, 0.0  ;;  %v896_v16 = vld [vmem:[%s863_s27 + $0x30] sm:$0xff]  ;;  %v899_v18 = vld [vmem:[%s863_s27 + $0x38] sm:$0xff]  ;;  %v902_v19 = vld [vmem:[%s863_s27 + $0x40] sm:$0xff] }
  0x1d   : > { %v226_v20 = vsel %vm214_vm1, %v896_v16, 0.0  ;;  %v907_v21 = vld [vmem:[%s863_s27 + $0x48] sm:$0xff]  ;;  %v910_v22 = vld [vmem:[%s863_s27 + $0x50] sm:$0xff]  ;;  %v913_v23 = vld [vmem:[%s863_s27 + $0x58] sm:$0xff]  ;;  %v228_v25 = vsel %vm214_vm1, %v899_v18, 0.0  ;;  %v230_v26 = vsel %vm214_vm1, %v902_v19, 0.0  ;;  %p709_p13 = pnand %p708_p12, %p837_p4 }
  0x1e   : > { %v219_v11 = vadd.f32 %v218_v6, %v217_v8  ;;  %v920_v27 = vld [vmem:[%s863_s27 + $0x108] sm:$0xff]  ;;  %v923_v28 = vld [vmem:[%s863_s27 + $0x110] sm:$0xff]  ;;  %v926_v29 = vld [vmem:[%s863_s27 + $0x118] sm:$0xff]  ;;  %v232_v30 = vsel %vm214_vm1, %v907_v21, 0.0  ;;  %v234_v31 = vsel %vm214_vm1, %v910_v22, 0.0  ;;  %v934_v32 = vsel %vm214_vm1, %v913_v23, 0.0 }
  0x1f   : > { %v937_v33 = vld [vmem:[%s863_s27 + $0x120] sm:$0xff]  ;;  %v940_v34 = vld [vmem:[%s863_s27 + $0x128] sm:$0xff]  ;;  %v943_v35 = vld [vmem:[%s863_s27 + $0x130] sm:$0xff]  ;;  %v947_v37 = vsel %vm214_vm1, %v920_v27, 0.0  ;;  %v951_v38 = vsel %vm214_vm1, %v923_v28, 0.0  ;;  %v955_v39 = vsel %vm214_vm1, %v926_v29, 0.0  ;;  %p710_p0 = pneg %p709_p13 }
  0x20   : > { %v221_v14 = vadd.f32 %v220_v9, %v219_v11  ;;  %1660 = vst [vmem:[#allocation5_spill] sm:$0xff] %v947_v37  ;;  %1661 = vst [vmem:[#allocation6_spill] sm:$0xff] %v951_v38  ;;  %v958_v40 = vld [vmem:[%s863_s27 + $0x138] sm:$0xff]  ;;  %v961_v41 = vld [vmem:[%s863_s27 + $0x140] sm:$0xff]  ;;  %v968_v43 = vsel %vm214_vm1, %v937_v33, 0.0  ;;  %v972_v44 = vsel %vm214_vm1, %v940_v34, 0.0 }
  0x21   : > { %1662 = vst [vmem:[#allocation7_spill] sm:$0xff] %v955_v39  ;;  %v964_v42 = vld [vmem:[%s863_s27 + $0x148] sm:$0xff]  ;;  %1663 = vst [vmem:[#allocation8_spill] sm:$0xff] %v968_v43  ;;  %v976_v45 = vsel %vm214_vm1, %v943_v35, 0.0  ;;  %v979_v46 = vld [vmem:[%s863_s27 + $0x150] sm:$0xff]  ;;  %v989_v50 = vsel %vm214_vm1, %v958_v40, 0.0 }
  0x22   : > { %v223_v17 = vadd.f32 %v222_v12, %v221_v14  ;;  %1664 = vst [vmem:[#allocation9_spill] sm:$0xff] %v972_v44  ;;  %1665 = vst [vmem:[#allocation10_spill] sm:$0xff] %v976_v45  ;;  %v982_v47 = vld [vmem:[%s863_s27 + $0x158] sm:$0xff]  ;;  %v985_v48 = vld [vmem:[%s863_s27 + $0x160] sm:$0xff]  ;;  %v993_v51 = vsel %vm214_vm1, %v961_v41, 0.0  ;;  %v997_v52 = vsel %vm214_vm1, %v964_v42, 0.0  ;;  %v353_v45 = vmul.f32 %v869_v2, %v869_v2 }
  0x23   : > { %1666 = vst [vmem:[#allocation11_spill] sm:$0xff] %v989_v50  ;;  %1667 = vst [vmem:[#allocation12_spill] sm:$0xff] %v993_v51  ;;  %v1000_v53 = vld [vmem:[%s863_s27 + $0x168] sm:$0xff]  ;;  %v1003_v54 = vld [vmem:[%s863_s27 + $0x170] sm:$0xff]  ;;  %v1010_v56 = vsel %vm214_vm1, %v979_v46, 0.0  ;;  %v1014_v57 = vsel %vm214_vm1, %v982_v47, 0.0  ;;  %v354_v44 = vmul.f32 %v872_v3, %v872_v3 }
  0x24   : > { %v225_v24 = vadd.f32 %v224_v15, %v223_v17  ;;  %1668 = vst [vmem:[#allocation13_spill] sm:$0xff] %v997_v52  ;;  %v1006_v55 = vld [vmem:[%s863_s27 + $0x178] sm:$0xff]  ;;  %1669 = vst [vmem:[#allocation14_spill] sm:$0xff] %v1010_v56  ;;  %v1018_v58 = vsel %vm214_vm1, %v985_v48, 0.0  ;;  %v1021_v59 = vld [vmem:[%s863_s27 + $0x180] sm:$0xff]  ;;  %v1031_v63 = vsel %vm214_vm1, %v1000_v53, 0.0 }
  0x25   : > { %1670 = vst [vmem:[#allocation15_spill] sm:$0xff] %v1014_v57  ;;  %1671 = vst [vmem:[#allocation16_spill] sm:$0xff] %v1018_v58  ;;  %v1024_v60 = vld [vmem:[%s863_s27 + $0x188] sm:$0xff]  ;;  %v1027_v61 = vld [vmem:[%s863_s27 + $0x190] sm:$0xff]  ;;  %v1035_v0 = vsel %vm214_vm1, %v1003_v54, 0.0  ;;  %v1039_v4 = vsel %vm214_vm1, %v1006_v55, 0.0 }
  0x26   : > { %v227_v36 = vadd.f32 %v226_v20, %v225_v24  ;;  %1672 = vst [vmem:[#allocation17_spill] sm:$0xff] %v1031_v63  ;;  %1673 = vst [vmem:[#allocation18_spill] sm:$0xff] %v1035_v0  ;;  %v1042_v5 = vld [vmem:[%s863_s27 + $0x198] sm:$0xff]  ;;  %v1045_v6 = vld [vmem:[%s863_s27 + $0x1a0] sm:$0xff]  ;;  %v1052_v9 = vsel %vm214_vm1, %v1021_v59, 0.0  ;;  %v1056_v11 = vsel %vm214_vm1, %v1024_v60, 0.0 }
  0x27   : > { %1674 = vst [vmem:[#allocation19_spill] sm:$0xff] %v1039_v4  ;;  %v1048_v8 = vld [vmem:[%s863_s27 + $0x1a8] sm:$0xff]  ;;  %1675 = vst [vmem:[#allocation20_spill] sm:$0xff] %v1052_v9  ;;  %v1060_v12 = vsel %vm214_vm1, %v1027_v61, 0.0  ;;  %v1063_v14 = vld [vmem:[%s863_s27 + $0x60] sm:$0xff]  ;;  %s711_s13 = sshll.u32 %s786_s12, 4  ;;  %s712_s13 = int_to_ptr.vmem [resolvable:$false] %s711_s13 }
  0x28   : > { %v229_v49 = vadd.f32 %v228_v25, %v227_v36  ;;  %1676 = vst [vmem:[#allocation21_spill] sm:$0xff] %v1056_v11  ;;  %1677 = vst [vmem:[#allocation22_spill] sm:$0xff] %v1060_v12  ;;  %v1066_v15 = vld [vmem:[%s863_s27 + $0x1b0] sm:$0xff]  ;;  %v1069_v17 = vld [vmem:[%s863_s27 + $0x1b8] sm:$0xff]  ;;  %v1076_v25 = vsel %vm214_vm1, %v1042_v5, 0.0  ;;  %v1084_v36 = vsel %vm214_vm1, %v1048_v8, 0.0  ;;  %p714_p1 = scmp.lt.s32.totalorder %s566_s29, %s712_s13 }
  0x29   : > { %v1072_v20 = vld [vmem:[%s863_s27 + $0x1c0] sm:$0xff]  ;;  %1678 = vst [vmem:[#allocation23_spill] sm:$0xff] %v1076_v25  ;;  %1680 = vst [vmem:[#allocation25_spill] sm:$0xff] %v1084_v36  ;;  %v1090_v12 = vld [vmem:[%s863_s27 + $0x1d0] sm:$0xff]  ;;  %s713_s9 = scalar_lea.vmem %s712_s13, 64 }
  0x2a   : > { %v231_v62 = vadd.f32 %v230_v26, %v229_v49  ;;  %v1080_v26 = vsel %vm214_vm1, %v1045_v6, 0.0  ;;  %v1087_v49 = vld [vmem:[%s863_s27 + $0x1c8] sm:$0xff]  ;;  %v1093_v11 = vld [vmem:[%s863_s27 + $0x1d8] sm:$0xff]  ;;  %v1108_v36 = vld [vmem:[%s863_s27 + $0x1e0] sm:$0xff]  ;;  %p715_p2 = scmp.lt.s32.totalorder %s713_s9, %s707_s5 }
  0x2b   : > { %1679 = vst [vmem:[#allocation24_spill] sm:$0xff] %v1080_v26  ;;  %v1105_v26 = vsel %vm214_vm1, %v1072_v20, 0.0  ;;  %1684 = vst [vmem:[#allocation29_spill] sm:$0xff] %v1108_v36  ;;  %v1111_v25 = vld [vmem:[%s863_s27 + $0x1e8] sm:$0xff]  ;;  %v1114_v9 = vld [vmem:[%s863_s27 + $0x1f0] sm:$0xff] }
  0x2c   : > { %v233_v24 = vadd.f32 %v232_v30, %v231_v62  ;;  %v1097_v30 = vsel %vm214_vm1, %v1066_v15, 0.0  ;;  %v1101_v62 = vsel %vm214_vm1, %v1069_v17, 0.0  ;;  %1683 = vst [vmem:[#allocation28_spill] sm:$0xff] %v1105_v26  ;;  %1685 = vst [vmem:[#allocation30_spill] sm:$0xff] %v1111_v25  ;;  %v1126_v26 = vsel %vm214_vm1, %v1093_v11, 0.0  ;;  %v1129_v0 = vld [vmem:[%s863_s27 + $0x1f8] sm:$0xff]  ;;  %p716_p3 = por %p715_p2, %p714_p1 }
  0x2d   : > { %1681 = vst [vmem:[#allocation26_spill] sm:$0xff] %v1097_v30  ;;  %1682 = vst [vmem:[#allocation27_spill] sm:$0xff] %v1101_v62  ;;  %v1118_v30 = vsel %vm214_vm1, %v1087_v49, 0.0  ;;  %v1122_v62 = vsel %vm214_vm1, %v1090_v12, 0.0  ;;  %v1149_v58 = vsel %vm214_vm1, %v1129_v0, 0.0  ;;  %v1154_v52 = vld [vmem:[%s863_s27 + $0x78] sm:$0xff] }
  0x2e   : > { %1686 = vst [vmem:[#allocation31_spill] sm:$0xff] %v1114_v9  ;;  %v235_v4 = vadd.f32 %v234_v31, %v233_v24  ;;  %1687 = vst [vmem:[#allocation32_spill] sm:$0xff] %v1118_v30  ;;  %v238_v31 = vsel %vm214_vm1, %v1063_v14, 0.0  ;;  %v1135_v24 = vsel %vm214_vm1, %v1108_v36, 0.0  ;;  %v1139_v30 = vsel %vm214_vm1, %v1111_v25, 0.0  ;;  %v1160_v51 = vld [vmem:[%s863_s27 + $0x88] sm:$0xff]  ;;  %p717_p5 = pnand %p716_p3, %p710_p0 }
  0x2f   : > { %1688 = vst [vmem:[#allocation33_spill] sm:$0xff] %v1122_v62  ;;  %1689 = vst [vmem:[#allocation34_spill] sm:$0xff] %v1126_v26  ;;  %v1143_v62 = vsel %vm214_vm1, %v1114_v9, 0.0  ;;  %v162_v26 = vld [vmem:[%s863_s27 + $0x68] sm:$0xff]  ;;  %v1172_v50 = vld [vmem:[%s863_s27 + $0xa0] sm:$0xff] }
  0x30   : > { %1690 = vst [vmem:[#allocation35_spill] sm:$0xff] %v1129_v0  ;;  %1691 = vst [vmem:[#allocation36_spill] sm:$0xff] %v1135_v24  ;;  %v237_v63 = vadd.f32 %v934_v32, %v235_v4  ;;  %v240_v57 = vsel %vm214_vm1, %v162_v26, 0.0  ;;  %v163_v24 = vld [vmem:[%s863_s27 + $0x70] sm:$0xff]  ;;  %v352_v32 = vmul.f32 %v866_v1, %v866_v1  ;;  %v1181_v1 = vld [vmem:[%s863_s27 + $0xa8] sm:$0xff] }
  0x31   : > { %1692 = vst [vmem:[#allocation37_spill] sm:$0xff] %v1139_v30  ;;  %1693 = vst [vmem:[#allocation38_spill] sm:$0xff] %v1143_v62  ;;  %v1157_v30 = vld [vmem:[%s863_s27 + $0x80] sm:$0xff]  ;;  %v242_v62 = vsel %vm214_vm1, %v163_v24, 0.0  ;;  %v1166_v4 = vld [vmem:[%s863_s27 + $0x90] sm:$0xff] }
  0x32   : > { %1694 = vst [vmem:[#allocation39_spill] sm:$0xff] %v1149_v58  ;;  %v239_v56 = vadd.f32 %v238_v31, %v237_v63  ;;  %1695 = vst [vmem:[#allocation40_spill] sm:$0xff] %v1154_v52  ;;  %v1169_v58 = vld [vmem:[%s863_s27 + $0x98] sm:$0xff]  ;;  %v244_v31 = vsel %vm214_vm1, %v1154_v52, 0.0  ;;  %v1184_v43 = vld [vmem:[%s863_s27 + $0xb0] sm:$0xff]  ;;  %v246_v39 = vsel %vm214_vm1, %v1157_v30, 0.0 }
  0x33   : > { %1696 = vst [vmem:[#allocation41_spill] sm:$0xff] %v1157_v30  ;;  %1697 = vst [vmem:[#allocation42_spill] sm:$0xff] %v1160_v51  ;;  %v252_v2 = vsel %vm214_vm1, %v1169_v58, 0.0  ;;  %v1195_v3 = vld [vmem:[%s863_s27 + $0xb8] sm:$0xff]  ;;  %v1198_v38 = vld [vmem:[%s863_s27 + $0xc0] sm:$0xff]  ;;  %v254_v30 = vsel %vm214_vm1, %v1172_v50, 0.0 }
  0x34   : > { %1698 = vst [vmem:[#allocation43_spill] sm:$0xff] %v1166_v4  ;;  %1699 = vst [vmem:[#allocation44_spill] sm:$0xff] %v1169_v58  ;;  %v241_v63 = vadd.f32 %v240_v57, %v239_v56  ;;  %v248_v56 = vsel %vm214_vm1, %v1160_v51, 0.0  ;;  %v250_v57 = vsel %vm214_vm1, %v1166_v4, 0.0  ;;  %v1201_v37 = vld [vmem:[%s863_s27 + $0xc8] sm:$0xff]  ;;  %v256_v51 = vsel %vm214_vm1, %v1181_v1, 0.0 }
  0x35   : > { %1700 = vst [vmem:[#allocation45_spill] sm:$0xff] %v1172_v50  ;;  %1701 = vst [vmem:[#allocation46_spill] sm:$0xff] %v1181_v1  ;;  %v355_v4 = vmul.f32 %v881_v7, %v881_v7  ;;  %v1210_v0 = vld [vmem:[%s863_s27 + $0xd0] sm:$0xff]  ;;  %v1213_v58 = vld [vmem:[%s863_s27 + $0xd8] sm:$0xff]  ;;  %v1217_v9 = vsel %vm214_vm1, %v1184_v43, 0.0  ;;  %v1229_v1 = vsel %vm214_vm1, %v1201_v37, 0.0 }
  0x36   : > { %1702 = vst [vmem:[#allocation47_spill] sm:$0xff] %v1184_v43  ;;  %1703 = vst [vmem:[#allocation48_spill] sm:$0xff] %v1195_v3  ;;  %v243_v52 = vadd.f32 %v242_v62, %v241_v63  ;;  %v1221_v62 = vsel %vm214_vm1, %v1195_v3, 0.0  ;;  %v1225_v63 = vsel %vm214_vm1, %v1198_v38, 0.0  ;;  %v1232_v7 = vld [vmem:[%s863_s27 + $0xe0] sm:$0xff]  ;;  %v1235_v50 = vld [vmem:[%s863_s27 + $0xe8] sm:$0xff] }
  0x37   : > { %1704 = vst [vmem:[#allocation49_spill] sm:$0xff] %v1198_v38  ;;  %1705 = vst [vmem:[#allocation50_spill] sm:$0xff] %v1201_v37  ;;  %v1238_v25 = vld [vmem:[%s863_s27 + $0xf0] sm:$0xff]  ;;  %v1242_v36 = vsel %vm214_vm1, %v1210_v0, 0.0  ;;  %v1246_v3 = vsel %vm214_vm1, %v1213_v58, 0.0  ;;  %v356_v38 = vmul.f32 %v886_v10, %v886_v10  ;;  %v1252_v37 = vsel %vm214_vm1, %v1232_v7, 0.0 }
  0x38   : > { %1706 = vst [vmem:[#allocation51_spill] sm:$0xff] %v1210_v0  ;;  %1707 = vst [vmem:[#allocation52_spill] sm:$0xff] %v1213_v58  ;;  %v245_v43 = vadd.f32 %v244_v31, %v243_v52  ;;  %v1260_v52 = vsel %vm214_vm1, %v1238_v25, 0.0  ;;  %v357_v31 = vmul.f32 %v891_v13, %v891_v13  ;;  %v358_v0 = vmul.f32 %v896_v16, %v896_v16 }
  0x39   : > { %1708 = vst [vmem:[#allocation53_spill] sm:$0xff] %v1229_v1  ;;  %1709 = vst [vmem:[#allocation54_spill] sm:$0xff] %v1232_v7  ;;  %v1256_v1 = vsel %vm214_vm1, %v1235_v50, 0.0  ;;  %v359_v10 = vmul.f32 %v899_v18, %v899_v18  ;;  %v360_v7 = vmul.f32 %v902_v19, %v902_v19  ;;  %v364_v13 = vmul.f32 %v1063_v14, %v1063_v14 }
  0x3a   : > { %1710 = vst [vmem:[#allocation55_spill] sm:$0xff] %v1235_v50  ;;  %1711 = vst [vmem:[#allocation56_spill] sm:$0xff] %v1238_v25  ;;  %v247_v58 = vadd.f32 %v246_v39, %v245_v43  ;;  %v361_v50 = vmul.f32 %v907_v21, %v907_v21  ;;  %v362_v25 = vmul.f32 %v910_v22, %v910_v22 }
  0x3b   : > { %1712 = vst [vmem:[#allocation57_spill] sm:$0xff] %v1260_v52  ;;  %v363_v52 = vmul.f32 %v913_v23, %v913_v23  ;;  %v1278_v16 = vmul.f32 %v162_v26, %v162_v26  ;;  %v1280_v43 = vmul.f32 %v163_v24, %v163_v24  ;;  %v385_v18 = vmul.f32 %v920_v27, %v920_v27 }
  0x3c   : > { %v249_v39 = vadd.f32 %v248_v56, %v247_v58  ;;  %v386_v19 = vmul.f32 %v923_v28, %v923_v28  ;;  %v387_v21 = vmul.f32 %v926_v29, %v926_v29  ;;  %v388_v22 = vmul.f32 %v937_v33, %v937_v33 }
  0x3d   : > { %v389_v23 = vmul.f32 %v940_v34, %v940_v34  ;;  %v390_v14 = vmul.f32 %v943_v35, %v943_v35  ;;  %v391_v26 = vmul.f32 %v958_v40, %v958_v40  ;;  %v392_v27 = vmul.f32 %v961_v41, %v961_v41 }
  0x3e   : > { %v251_v58 = vadd.f32 %v250_v57, %v249_v39  ;;  %v393_v28 = vmul.f32 %v964_v42, %v964_v42  ;;  %v394_v29 = vmul.f32 %v979_v46, %v979_v46  ;;  %v395_v33 = vmul.f32 %v982_v47, %v982_v47  ;;  %v1713_v39 = vld [vmem:[#allocation29_spill] sm:$0xff] }
  0x3f   : > { %v416_v34 = vsel %vm214_vm1, %v352_v32, 0.0  ;;  %v396_v35 = vmul.f32 %v985_v48, %v985_v48  ;;  %v417_v40 = vsel %vm214_vm1, %v353_v45, 0.0  ;;  %v419_v56 = vsel %vm214_vm1, %v354_v44, 0.0 }
  0x40   : > { %v253_v24 = vadd.f32 %v252_v2, %v251_v58  ;;  %v397_v41 = vmul.f32 %v1000_v53, %v1000_v53  ;;  %v398_v42 = vmul.f32 %v1003_v54, %v1003_v54  ;;  %v399_v46 = vmul.f32 %v1006_v55, %v1006_v55  ;;  %v1714_v58 = vld [vmem:[#allocation30_spill] sm:$0xff] }
  0x41   : > { %v418_v47 = vadd.f32 %v417_v40, %v416_v34  ;;  %v400_v32 = vmul.f32 %v1021_v59, %v1021_v59  ;;  %v401_v48 = vmul.f32 %v1024_v60, %v1024_v60  ;;  %v421_v45 = vsel %vm214_vm1, %v355_v4, 0.0  ;;  %v1715_v34 = vld [vmem:[#allocation31_spill] sm:$0xff] }
  0x42   : > { %v255_v57 = vadd.f32 %v254_v30, %v253_v24  ;;  %v402_v44 = vmul.f32 %v1027_v61, %v1027_v61  ;;  %v403_v53 = vmul.f32 %v1042_v5, %v1042_v5  ;;  %v404_v54 = vmul.f32 %v1045_v6, %v1045_v6  ;;  %v1716_v40 = vld [vmem:[#allocation35_spill] sm:$0xff] }
  0x43   : > { %v420_v55 = vadd.f32 %v419_v56, %v418_v47  ;;  %v405_v30 = vmul.f32 %v1048_v8, %v1048_v8  ;;  %v406_v59 = vmul.f32 %v1066_v15, %v1066_v15  ;;  %v423_v60 = vsel %vm214_vm1, %v356_v38, 0.0 }
  0x44   : > { %v257_v2 = vadd.f32 %v256_v51, %v255_v57  ;;  %v407_v4 = vmul.f32 %v1069_v17, %v1069_v17  ;;  %v408_v61 = vmul.f32 %v1072_v20, %v1072_v20  ;;  %v409_v5 = vmul.f32 %v1087_v49, %v1087_v49 }
  0x45   : > { %v422_v6 = vadd.f32 %v421_v45, %v420_v55  ;;  %v410_v8 = vmul.f32 %v1090_v12, %v1090_v12  ;;  %v411_v15 = vmul.f32 %v1093_v11, %v1093_v11  ;;  %v425_v38 = vsel %vm214_vm1, %v357_v31, 0.0 }
  0x46   : > { %v259_v51 = vadd.f32 %v1217_v9, %v257_v2  ;;  %v412_v17 = vmul.f32 %v1713_v39, %v1713_v39  ;;  %v413_v20 = vmul.f32 %v1714_v58, %v1714_v58  ;;  %v414_v49 = vmul.f32 %v1715_v34, %v1715_v34 }
  0x47   : > { %v424_v24 = vadd.f32 %v423_v60, %v422_v6  ;;  %v415_v12 = vmul.f32 %v1716_v40, %v1716_v40  ;;  %v427_v56 = vsel %vm214_vm1, %v358_v0, 0.0  ;;  %v429_v11 = vsel %vm214_vm1, %v359_v10, 0.0  ;;  %v1719_v40 = vld [vmem:[#allocation40_spill] sm:$0xff] }
  0x48   : > { %v261_v9 = vadd.f32 %v1221_v62, %v259_v51  ;;  %v431_v47 = vsel %vm214_vm1, %v360_v7, 0.0  ;;  %v433_v57 = vsel %vm214_vm1, %v361_v50, 0.0  ;;  %v435_v45 = vsel %vm214_vm1, %v362_v25, 0.0  ;;  %v1717_v25 = vld [vmem:[#allocation53_spill] sm:$0xff] }
  0x49   : > { %v426_v31 = vadd.f32 %v425_v38, %v424_v24  ;;  %v437_v2 = vsel %vm214_vm1, %v363_v52, 0.0  ;;  %v439_v62 = vsel %vm214_vm1, %v364_v13, 0.0  ;;  %v1361_v60 = vsel %vm214_vm1, %v385_v18, 0.0  ;;  %v1464_v24 = vld [vmem:[%s863_s27 + $0x100] sm:$0xff] }
  0x4a   : > { %v263_v55 = vadd.f32 %v1225_v63, %v261_v9  ;;  %v1364_v0 = vsel %vm214_vm1, %v386_v19, 0.0  ;;  %v1367_v10 = vsel %vm214_vm1, %v387_v21, 0.0  ;;  %v1370_v50 = vsel %vm214_vm1, %v388_v22, 0.0 }
  0x4b   : > { %v428_v6 = vadd.f32 %v427_v56, %v426_v31  ;;  %v1374_v63 = vsel %vm214_vm1, %v389_v23, 0.0  ;;  %v1377_v52 = vsel %vm214_vm1, %v390_v14, 0.0  ;;  %v1380_v13 = vsel %vm214_vm1, %v391_v26, 0.0 }
  0x4c   : > { %v265_v7 = vadd.f32 %v1717_v25, %v263_v55  ;;  %v1383_v19 = vsel %vm214_vm1, %v392_v27, 0.0  ;;  %v1386_v21 = vsel %vm214_vm1, %v393_v28, 0.0  ;;  %v1389_v22 = vsel %vm214_vm1, %v394_v29, 0.0  ;;  %v1721_v55 = vld [vmem:[#allocation42_spill] sm:$0xff] }
  0x4d   : > { %v430_v18 = vadd.f32 %v429_v11, %v428_v6  ;;  %v1393_v23 = vsel %vm214_vm1, %v395_v33, 0.0  ;;  %v1396_v14 = vsel %vm214_vm1, %v396_v35, 0.0  ;;  %v1399_v26 = vsel %vm214_vm1, %v397_v41, 0.0  ;;  %v1720_v11 = vld [vmem:[#allocation41_spill] sm:$0xff] }
  0x4e   : > { %v267_v51 = vadd.f32 %v1242_v36, %v265_v7  ;;  %v1402_v27 = vsel %vm214_vm1, %v398_v42, 0.0  ;;  %v1405_v28 = vsel %vm214_vm1, %v399_v46, 0.0  ;;  %v1408_v29 = vsel %vm214_vm1, %v400_v32, 0.0 }
  0x4f   : > { %v432_v38 = vadd.f32 %v431_v47, %v430_v18  ;;  %v1412_v33 = vsel %vm214_vm1, %v401_v48, 0.0  ;;  %v1415_v35 = vsel %vm214_vm1, %v402_v44, 0.0  ;;  %v1418_v41 = vsel %vm214_vm1, %v403_v53, 0.0  ;;  %v1723_v18 = vld [vmem:[#allocation43_spill] sm:$0xff] }
  0x50   : > { %v269_v36 = vadd.f32 %v1246_v3, %v267_v51  ;;  %v1421_v39 = vsel %vm214_vm1, %v404_v54, 0.0  ;;  %v1424_v46 = vsel %vm214_vm1, %v405_v30, 0.0  ;;  %v1427_v32 = vsel %vm214_vm1, %v406_v59, 0.0 }
  0x51   : > { %v434_v42 = vadd.f32 %v433_v57, %v432_v38  ;;  %v1431_v48 = vsel %vm214_vm1, %v407_v4, 0.0  ;;  %v1434_v44 = vsel %vm214_vm1, %v408_v61, 0.0  ;;  %v1437_v53 = vsel %vm214_vm1, %v409_v5, 0.0 }
  0x52   : > { %v271_v3 = vadd.f32 %v1252_v37, %v269_v36  ;;  %v1440_v58 = vsel %vm214_vm1, %v410_v8, 0.0  ;;  %v1443_v30 = vsel %vm214_vm1, %v411_v15, 0.0  ;;  %v1446_v59 = vsel %vm214_vm1, %v412_v17, 0.0  ;;  %v1449_v37 = vld [vmem:[%s863_s27 + $0xf8] sm:$0xff]  ;;  %v1718_v17 = vld [vmem:[#allocation57_spill] sm:$0xff]  ;;  %v1724_v36 = vld [vmem:[#allocation6_spill] sm:$0xff] }
  0x53   : > { %v436_v54 = vadd.f32 %v435_v45, %v434_v42  ;;  %v1453_v61 = vsel %vm214_vm1, %v413_v20, 0.0  ;;  %v1456_v5 = vsel %vm214_vm1, %v414_v49, 0.0  ;;  %v1459_v34 = vsel %vm214_vm1, %v415_v12, 0.0 }
  0x54   : > { %v273_v4 = vadd.f32 %v1256_v1, %v271_v3  ;;  %v276_v8 = vsel %vm214_vm1, %v1449_v37, 0.0  ;;  %v367_v1 = vmul.f32 %v1719_v40, %v1719_v40  ;;  %v441_v20 = vsel %vm214_vm1, %v1278_v16, 0.0  ;;  %v1722_v16 = vld [vmem:[#allocation5_spill] sm:$0xff]  ;;  %v1725_v3 = vld [vmem:[#allocation44_spill] sm:$0xff] }
  0x55   : > { %v438_v15 = vadd.f32 %v437_v2, %v436_v54  ;;  %v278_v49 = vsel %vm214_vm1, %v1464_v24, 0.0  ;;  %v368_v31 = vmul.f32 %v1720_v11, %v1720_v11  ;;  %v443_v47 = vsel %vm214_vm1, %v1280_v43, 0.0 }
  0x56   : > { %v275_v9 = vadd.f32 %v1718_v17, %v273_v4  ;;  %v369_v2 = vmul.f32 %v1721_v55, %v1721_v55  ;;  %v445_v6 = vsel %vm214_vm1, %v367_v1, 0.0  ;;  %v371_v43 = vmul.f32 %v1725_v3, %v1725_v3  ;;  %v1727_v17 = vld [vmem:[#allocation45_spill] sm:$0xff] }
  0x57   : > { %v440_v56 = vadd.f32 %v439_v62, %v438_v15  ;;  %v370_v62 = vmul.f32 %v1723_v18, %v1723_v18  ;;  %v447_v51 = vsel %vm214_vm1, %v368_v31, 0.0 }
  0x58   : > { %v277_v12 = vadd.f32 %v276_v8, %v275_v9  ;;  %v449_v54 = vsel %vm214_vm1, %v369_v2, 0.0  ;;  %v1726_v8 = vld [vmem:[#allocation7_spill] sm:$0xff]  ;;  %v372_v9 = vmul.f32 %v1727_v17, %v1727_v17  ;;  %v453_v11 = vsel %vm214_vm1, %v371_v43, 0.0 }
  0x59   : > { %v442_v57 = vadd.f32 %v441_v20, %v440_v56  ;;  %v451_v40 = vsel %vm214_vm1, %v370_v62, 0.0  ;;  %v1728_v20 = vld [vmem:[#allocation8_spill] sm:$0xff]  ;;  %v1729_v56 = vld [vmem:[#allocation46_spill] sm:$0xff] }
  0x5a   : > { %v279_v45 = vadd.f32 %v278_v49, %v277_v12  ;;  %v373_v12 = vmul.f32 %v1729_v56, %v1729_v56  ;;  %v455_v2 = vsel %vm214_vm1, %v372_v9, 0.0 }
  0x5b   : > { %v444_v25 = vadd.f32 %v443_v47, %v442_v57  ;;  %v1730_v47 = vld [vmem:[#allocation9_spill] sm:$0xff] }
  0x5c   : > { %v281_v7 = vadd.f32 %v1722_v16, %v279_v45  ;;  %v1731_v45 = vld [vmem:[#allocation47_spill] sm:$0xff]  ;;  %v457_v62 = vsel %vm214_vm1, %v373_v12, 0.0 }
  0x5d   : > { %v446_v38 = vadd.f32 %v445_v6, %v444_v25  ;;  %v374_v55 = vmul.f32 %v1731_v45, %v1731_v45  ;;  %v1732_v25 = vld [vmem:[#allocation10_spill] sm:$0xff] }
  0x5e   : > { %v283_v42 = vadd.f32 %v1724_v36, %v281_v7  ;;  %v1733_v7 = vld [vmem:[#allocation48_spill] sm:$0xff] }
  0x5f   : > { %v448_v4 = vadd.f32 %v447_v51, %v446_v38  ;;  %v375_v18 = vmul.f32 %v1733_v7, %v1733_v7  ;;  %v1734_v38 = vld [vmem:[#allocation11_spill] sm:$0xff]  ;;  %v459_v43 = vsel %vm214_vm1, %v374_v55, 0.0 }
  0x60   : > { %v285_v15 = vadd.f32 %v1726_v8, %v283_v42  ;;  %v1735_v42 = vld [vmem:[#allocation49_spill] sm:$0xff] }
  0x61   : > { %v450_v1 = vadd.f32 %v449_v54, %v448_v4  ;;  %v376_v3 = vmul.f32 %v1735_v42, %v1735_v42  ;;  %v1736_v4 = vld [vmem:[#allocation12_spill] sm:$0xff]  ;;  %v461_v9 = vsel %vm214_vm1, %v375_v18, 0.0 }
  0x62   : > { %v287_v49 = vadd.f32 %v1728_v20, %v285_v15  ;;  %v1737_v15 = vld [vmem:[#allocation50_spill] sm:$0xff] }
  0x63   : > { %v452_v31 = vadd.f32 %v451_v40, %v450_v1  ;;  %v377_v17 = vmul.f32 %v1737_v15, %v1737_v15  ;;  %v1738_v1 = vld [vmem:[#allocation13_spill] sm:$0xff]  ;;  %v463_v12 = vsel %vm214_vm1, %v376_v3, 0.0 }
  0x64   : > { %v289_v57 = vadd.f32 %v1730_v47, %v287_v49  ;;  %v1739_v49 = vld [vmem:[#allocation51_spill] sm:$0xff] }
  0x65   : > { %v454_v6 = vadd.f32 %v453_v11, %v452_v31  ;;  %v378_v56 = vmul.f32 %v1739_v49, %v1739_v49  ;;  %v1740_v31 = vld [vmem:[#allocation14_spill] sm:$0xff]  ;;  %v465_v55 = vsel %vm214_vm1, %v377_v17, 0.0 }
  0x66   : > { %v291_v16 = vadd.f32 %v1732_v25, %v289_v57  ;;  %v1741_v57 = vld [vmem:[#allocation52_spill] sm:$0xff] }
  0x67   : > { %v456_v51 = vadd.f32 %v455_v2, %v454_v6  ;;  %v379_v45 = vmul.f32 %v1741_v57, %v1741_v57  ;;  %v1742_v6 = vld [vmem:[#allocation15_spill] sm:$0xff]  ;;  %v467_v18 = vsel %vm214_vm1, %v378_v56, 0.0 }
  0x68   : > { %v293_v36 = vadd.f32 %v1734_v38, %v291_v16  ;;  %v1743_v16 = vld [vmem:[#allocation54_spill] sm:$0xff] }
  0x69   : > { %v458_v54 = vadd.f32 %v457_v62, %v456_v51  ;;  %v380_v7 = vmul.f32 %v1743_v16, %v1743_v16  ;;  %v1744_v51 = vld [vmem:[#allocation16_spill] sm:$0xff]  ;;  %v469_v3 = vsel %vm214_vm1, %v379_v45, 0.0 }
  0x6a   : > { %v295_v8 = vadd.f32 %v1736_v4, %v293_v36  ;;  %v1745_v36 = vld [vmem:[#allocation55_spill] sm:$0xff]  ;;  %v1750_v45 = vld [vmem:[#allocation20_spill] sm:$0xff] }
  0x6b   : > { %v460_v40 = vadd.f32 %v459_v43, %v458_v54  ;;  %v381_v42 = vmul.f32 %v1745_v36, %v1745_v36  ;;  %v1746_v54 = vld [vmem:[#allocation17_spill] sm:$0xff]  ;;  %v471_v17 = vsel %vm214_vm1, %v380_v7, 0.0 }
  0x6c   : > { %v297_v20 = vadd.f32 %v1738_v1, %v295_v8  ;;  %v1747_v8 = vld [vmem:[#allocation56_spill] sm:$0xff] }
  0x6d   : > { %v462_v11 = vadd.f32 %v461_v9, %v460_v40  ;;  %v382_v15 = vmul.f32 %v1747_v8, %v1747_v8  ;;  %v1748_v40 = vld [vmem:[#allocation18_spill] sm:$0xff]  ;;  %v473_v49 = vsel %vm214_vm1, %v381_v42, 0.0  ;;  %v1754_v42 = vld [vmem:[#allocation24_spill] sm:$0xff] }
  0x6e   : > { %v299_v47 = vadd.f32 %v1740_v31, %v297_v20  ;;  %v383_v20 = vmul.f32 %v1449_v37, %v1449_v37  ;;  %v384_v31 = vmul.f32 %v1464_v24, %v1464_v24 }
  0x6f   : > { %v464_v2 = vadd.f32 %v463_v12, %v462_v11  ;;  %v1749_v12 = vld [vmem:[#allocation19_spill] sm:$0xff] }
  0x70   : > { %v301_v25 = vadd.f32 %v1742_v6, %v299_v47  ;;  %v475_v47 = vsel %vm214_vm1, %v382_v15, 0.0  ;;  %v479_v37 = vsel %vm214_vm1, %v384_v31, 0.0  ;;  %v1756_v15 = vld [vmem:[#allocation26_spill] sm:$0xff]  ;;  %v1760_v31 = vld [vmem:[#allocation33_spill] sm:$0xff] }
  0x71   : > { %v466_v62 = vadd.f32 %v465_v55, %v464_v2  ;;  %v477_v2 = vsel %vm214_vm1, %v383_v20, 0.0 }
  0x72   : > { %v303_v38 = vadd.f32 %v1744_v51, %v301_v25  ;;  %v1751_v25 = vld [vmem:[#allocation21_spill] sm:$0xff] }
  0x73   : > { %v468_v43 = vadd.f32 %v467_v18, %v466_v62  ;;  %v1752_v18 = vld [vmem:[#allocation22_spill] sm:$0xff] }
  0x74   : > { %v305_v4 = vadd.f32 %v1746_v54, %v303_v38  ;;  %v1753_v38 = vld [vmem:[#allocation23_spill] sm:$0xff]  ;;  %v1755_v54 = vld [vmem:[#allocation25_spill] sm:$0xff] }
  0x75   : > { %v470_v9 = vadd.f32 %v469_v3, %v468_v43 }
  0x76   : > { %v307_v1 = vadd.f32 %v1748_v40, %v305_v4  ;;  %v1757_v40 = vld [vmem:[#allocation27_spill] sm:$0xff] }
  0x77   : > { %v472_v56 = vadd.f32 %v471_v17, %v470_v9 }
  0x78   : > { %v309_v11 = vadd.f32 %v1749_v12, %v307_v1  ;;  %v1759_v12 = vld [vmem:[#allocation32_spill] sm:$0xff] }
  0x79   : > { %v474_v57 = vadd.f32 %v473_v49, %v472_v56  ;;  %v1758_v49 = vld [vmem:[#allocation28_spill] sm:$0xff] }
  0x7a   : > { %v311_v55 = vadd.f32 %v1750_v45, %v309_v11 }
  0x7b   : > { %v476_v6 = vadd.f32 %v475_v47, %v474_v57  ;;  %v1761_v57 = vld [vmem:[#allocation34_spill] sm:$0xff] }
  0x7c   : > { %v313_v16 = vadd.f32 %v1751_v25, %v311_v55  ;;  %v1762_v55 = vld [vmem:[#allocation36_spill] sm:$0xff] }
  0x7d   : > { %v478_v7 = vadd.f32 %v477_v2, %v476_v6  ;;  %v1763_v6 = vld [vmem:[#allocation37_spill] sm:$0xff] }
  0x7e   : > { %v315_v62 = vadd.f32 %v1752_v18, %v313_v16  ;;  %v1764_v16 = vld [vmem:[#allocation38_spill] sm:$0xff] }
  0x7f   : > { %v480_v51 = vadd.f32 %v479_v37, %v478_v7  ;;  %v1765_v7 = vld [vmem:[#allocation39_spill] sm:$0xff] }
  0x80   : > { %v317_v36 = vadd.f32 %v1753_v38, %v315_v62 }
  0x81   : > { %v482_v24 = vadd.f32 %v1361_v60, %v480_v51 }
  0x82   : > { %v319_v3 = vadd.f32 %v1754_v42, %v317_v36 }
  0x83   : > { %v484_v43 = vadd.f32 %v1364_v0, %v482_v24 }
  0x84   : > { %v321_v4 = vadd.f32 %v1755_v54, %v319_v3  ;;  %v213_v3 = vld [vmem:[%s857_s23] sm:$0x1] }
  0x85   : > { %v486_v8 = vadd.f32 %v1367_v10, %v484_v43 }
  0x86   : > { %v323_v17 = vadd.f32 %v1756_v15, %v321_v4 }
  0x87   : > { %v488_v9 = vadd.f32 %v1370_v50, %v486_v8 }
  0x88   : > { %v325_v1 = vadd.f32 %v1757_v40, %v323_v17  ;;  %v351_v40 = vld [vmem:[%s857_s23 + $0x1] sm:$0x1] }
  0x89   : > { %v490_v20 = vadd.f32 %v1374_v63, %v488_v9 }
  0x8a   : > { %v327_v56 = vadd.f32 %v1758_v49, %v325_v1 }
  0x8b   : > { %v492_v60 = vadd.f32 %v1377_v52, %v490_v20 }
  0x8c   : > { %v329_v11 = vadd.f32 %v1759_v12, %v327_v56 }
  0x8d   : > { %v494_v0 = vadd.f32 %v1380_v13, %v492_v60 }
  0x8e   : > { %v331_v47 = vadd.f32 %v1760_v31, %v329_v11 }
  0x8f   : > { %v496_v10 = vadd.f32 %v1383_v19, %v494_v0 }
  0x90   : > { %v333_v45 = vadd.f32 %v1761_v57, %v331_v47 }
  0x91   : > { %v498_v50 = vadd.f32 %v1386_v21, %v496_v10 }
  0x92   : > { %v335_v2 = vadd.f32 %v1762_v55, %v333_v45 }
  0x93   : > { %v500_v63 = vadd.f32 %v1389_v22, %v498_v50 }
  0x94   : > { %v337_v25 = vadd.f32 %v1763_v6, %v335_v2 }
  0x95   : > { %v502_v52 = vadd.f32 %v1393_v23, %v500_v63 }
  0x96   : > { %v339_v37 = vadd.f32 %v1764_v16, %v337_v25 }
  0x97   : > { %v504_v13 = vadd.f32 %v1396_v14, %v502_v52 }
  0x98   : > { %v341_v18 = vadd.f32 %v1765_v7, %v339_v37 }
  0x99   : > { %v506_v19 = vadd.f32 %v1399_v26, %v504_v13 }
  0x9a   : > { %v342_v62 = vrot.slane %v341_v18, 4 }
  0x9b   : > { %v508_v21 = vadd.f32 %v1402_v27, %v506_v19 }
  0x9c   : > { %v343_v51 = vadd.f32 %v342_v62, %v341_v18 }
  0x9d   : > { %v510_v22 = vadd.f32 %v1405_v28, %v508_v21 }
  0x9e   : > { %v344_v38 = vrot.slane %v343_v51, 2 }
  0x9f   : > { %v512_v36 = vadd.f32 %v1408_v29, %v510_v22 }
  0xa0   : > { %v345_v24 = vadd.f32 %v344_v38, %v343_v51 }
  0xa1   : > { %v514_v23 = vadd.f32 %v1412_v33, %v512_v36 }
  0xa2   : > { %v346_v42 = vrot.slane %v345_v24, 1 }
  0xa3   : > { %v516_v14 = vadd.f32 %v1415_v35, %v514_v23 }
  0xa4   : > { %v347_v43 = vadd.f32 %v346_v42, %v345_v24 }
  0xa5   : > { %v518_v26 = vadd.f32 %v1418_v41, %v516_v14 }
  0xa6   : > { %v348_v54 = vadd.f32 %v347_v43, %v213_v3 }
  0xa7   : > { %v520_v27 = vadd.f32 %v1421_v39, %v518_v26 }
  0xa8   : > { %350 = vst.msk [vmem:[%s857_s23] sm:$0x1] %vm349_vm2, %v348_v54 }
  0xa9   : > { %v522_v28 = vadd.f32 %v1424_v46, %v520_v27 }
  0xab   : > { %v524_v29 = vadd.f32 %v1427_v32, %v522_v28 }
  0xad   : > { %v526_v33 = vadd.f32 %v1431_v48, %v524_v29 }
  0xaf   : > { %v528_v35 = vadd.f32 %v1434_v44, %v526_v33 }
  0xb1   : > { %v530_v4 = vadd.f32 %v1437_v53, %v528_v35 }
  0xb3   : > { %v532_v41 = vadd.f32 %v1440_v58, %v530_v4 }
  0xb5   : > { %v534_v8 = vadd.f32 %v1443_v30, %v532_v41 }
  0xb7   : > { %v536_v39 = vadd.f32 %v1446_v59, %v534_v8 }
  0xb9   : > { %v538_v46 = vadd.f32 %v1453_v61, %v536_v39 }
  0xbb   : > { %v540_v32 = vadd.f32 %v1456_v5, %v538_v46 }
  0xbd   : > { %v542_v15 = vadd.f32 %v1459_v34, %v540_v32 }
  0xbf   : > { %v543_v48 = vrot.slane %v542_v15, 4 }
  0xc1   : > { %v544_v17 = vadd.f32 %v543_v48, %v542_v15 }
  0xc3   : > { %v545_v44 = vrot.slane %v544_v17, 2 }
  0xc5   : > { %v546_v9 = vadd.f32 %v545_v44, %v544_v17 }
  0xc7   : > { %v547_v53 = vrot.slane %v546_v9, 1 }
  0xc9   : > { %v548_v58 = vadd.f32 %v547_v53, %v546_v9 }
  0xcb   : > { %v549_v30 = vadd.f32 %v548_v58, %v351_v40 }
  0xcd   : > { %550 = vst.msk [vmem:[%s857_s23 + $0x1] sm:$0x1] %vm349_vm2, %v549_v30 }
  0xce   : > { %720 = shalt.err (!%p717_p5)
}
  0xcf   : > { %s721_s15 = scalar_lea.hbm %s563_s3, 32  ;;  %s725_s21 = scalar_lea.hbm %s1637_s1, 64 }
  0xd0   : > { %p722_p6 = scmp.ne.s32.totalorder %s563_s3, %s721_s15  ;;  %p726_p10 = scmp.lt.s32.totalorder %s563_s3, %s1637_s1 }
  0xd1   : > { %p727_p11 = scmp.lt.s32.totalorder %s725_s21, %s721_s15 }
  0xd2   : > { %p723_p7 = pnand %p722_p6, %p837_p4 }
  0xd3   : > { %p728_p12 = por %p727_p11, %p726_p10 }
  0xd4   : > { %p724_p9 = pneg %p723_p7 }
  0xd6   : > { %p729_p13 = pnand %p728_p12, %p724_p9 }
  0xd8   : > { %732 = shalt.err (!%p729_p13)
}
  0xd9   : > { %651 = dma.vmem_to_hbm [thread:$0]  (%p837_p4), %s566_s29, 32, %s563_s3, %s552_s4  }
  0xda PF: > { %p657_p0 = scmp.ge.s32.totalorder %s783_s11, 2  ;;  %s577_s24 = sand.u32 1, %s763_s6  }
  0xdb   : > { %s578_s25 = scalar_lea.sflag [#allocation3], %s577_s24 }
  0xdc   : > { %p654_p1 = pnand %p657_p0, %p844_p8 }
  0xde   : > { %p655_p2 = pneg %p654_p1 }
  0xe0   : > { %758 = dma.done.wait (%p655_p2), %s578_s25, 32  }
  0xe1   : > { %760 = vsyncadd (%p655_p2), %s578_s25, 4294967264  ;;  %s14_s11 = sadd.s32 1, %s783_s11   ;;  %s1766_s6 = smov %s767_s7 }
  0xe2   : > { %p11_p3 = scmp.ge.s32.totalorder %s14_s11, 4   ;;  %s1767_s7 = smov %s771_s8 }
  0xe3   : > { %s1768_s8 = smov %s850_s19  ;;  %s1769_s9 = smov %s779_s10 }
  0xe4   : > { %s1770_s10 = smov %s1772_s14  ;;  %13 = sbr.rel (!%p11_p3) target bundleno = 4 (0x4), region = 63 }
  0xe9   :  { %583 = vsyncpa [#allocation3], 1 }
  0xea   :  { %585 = vsyncpa [#allocation3 + $0x1], 1 }

</bundles_post_ra>
